<compile_context>
chip_gen: v7x
topology: tpu7x:2x2x1
jax: 0.10.0
libtpu: 0.0.40
codegen_flags: <defaults>
</compile_context>

<pallas_src>
import functools

import jax
import jax.numpy as jnp
import numpy as np
from jax.experimental import pallas as pl
from jax.experimental.pallas import tpu as pltpu

EPS = 1e-3
LANES = 128
SUBLANES = 8
MAX_TILE_ROWS = 1024  # 1024 x 128 f32 = 512 KiB per input block


def _charbonnier_kernel(x_ref, y_ref, out_ref, *, eps_sq, n_valid, tile_rows,
                        needs_mask):
    i = pl.program_id(0)

    x = x_ref[...].astype(jnp.float32)
    y = y_ref[...].astype(jnp.float32)
    d = x - y
    v = d * d + jnp.float32(eps_sq)          # v >= eps^2 > 0, always finite for valid data

    # sqrt(v) = v * rsqrt(v); one Newton-Raphson step on rsqrt makes the result
    # accurate to ~1 ulp regardless of the hardware EUP approximation quality
    # (the refinement itself is pure VPU work, only one EUP op per element).
    r = jax.lax.rsqrt(v)
    r = r * (1.5 - 0.5 * v * r * r)
    s = v * r

    if needs_mask:
        # Zero out padded tail elements and any rows past the end of the array
        # in a partial last block (their contents are undefined).
        row = jax.lax.broadcasted_iota(jnp.int32, (tile_rows, LANES), 0)
        lane = jax.lax.broadcasted_iota(jnp.int32, (tile_rows, LANES), 1)
        gidx = (i * tile_rows + row) * LANES + lane
        s = jnp.where(gidx < n_valid, s, 0.0)

    # (tile_rows, 128) -> (tile_rows//8, 8, 128); summing over axis 0 is plain
    # vreg adds (VPU).  The single cross-lane reduction happens in the wrapper,
    # so there is no cross-step accumulator and the grid axis stays parallel.
    partial = jnp.sum(s.reshape(tile_rows // SUBLANES, SUBLANES, LANES), axis=0)
    out_ref[0] = partial


def charbonnier_loss(x, y, eps=EPS):
    assert x.shape == y.shape
    n_valid = x.size

    xf = jnp.ravel(x)
    yf = jnp.ravel(y)

    unit = SUBLANES * LANES  # 1024 -> rows is always a multiple of 8
    padded = pl.cdiv(n_valid, unit) * unit
    pad = padded - n_valid
    if pad:
        # Small (<1024-element) zero pad, only for ragged sizes; padded
        # elements are masked out exactly inside the kernel (no eps correction).
        xf = jnp.pad(xf, (0, pad))
        yf = jnp.pad(yf, (0, pad))

    rows = padded // LANES                 # multiple of 8
    tile_rows = min(MAX_TILE_ROWS, rows)   # multiple of 8 (or full extent)
    num_blocks = pl.cdiv(rows, tile_rows)
    needs_mask = (pad != 0) or (rows % tile_rows != 0)

    x2d = xf.reshape(rows, LANES)
    y2d = yf.reshape(rows, LANES)

    kernel = functools.partial(
        _charbonnier_kernel,
        eps_sq=float(eps) * float(eps),
        n_valid=n_valid,
        tile_rows=tile_rows,
        needs_mask=needs_mask,
    )

    partials = pl.pallas_call(
        kernel,
        out_shape=jax.ShapeDtypeStruct((num_blocks, SUBLANES, LANES),
                                       jnp.float32),
        grid_spec=pltpu.PrefetchScalarGridSpec(
            num_scalar_prefetch=0,
            grid=(num_blocks,),
            in_specs=[
                pl.BlockSpec((tile_rows, LANES), lambda i: (i, 0)),
                pl.BlockSpec((tile_rows, LANES), lambda i: (i, 0)),
            ],
            out_specs=pl.BlockSpec((1, SUBLANES, LANES), lambda i: (i, 0, 0)),
        ),
        compiler_params=pltpu.CompilerParams(
            dimension_semantics=("parallel",),
        ),
    )(x2d, y2d)

    # Tiny final reduction over num_blocks * 1024 partials in plain XLA.
    return jnp.sum(partials) / jnp.float32(n_valid)


if __name__ == "__main__":
    key = jax.random.PRNGKey(0)
    kx, ky = jax.random.split(key)
    shape = (2, 4, 16, 16)  # N, C, H, W
    x = jax.random.normal(kx, shape, dtype=jnp.float32)
    y = jax.random.normal(ky, shape, dtype=jnp.float32)

    loss = charbonnier_loss(x, y)
    loss = jax.block_until_ready(loss)

    # Ground-truth reference in float64 on the host (independent of the TPU's
    # own sqrt / reduction precision).
    xn = np.asarray(x, dtype=np.float64)
    yn = np.asarray(y, dtype=np.float64)
    dn = xn - yn
    ref = float(np.mean(np.sqrt(dn * dn + EPS * EPS)))

    loss_f = float(loss)
    assert np.isfinite(loss_f), loss_f
    assert abs(loss_f - ref) <= 1e-5 * abs(ref) + 1e-6, (loss_f, ref)
    print("KERNEL_OK")
</pallas_src>

<mosaic_0001>
module attributes {stable_mosaic.version = 11 : i64} {
  func.func @_charbonnier_kernel(%arg0: i32, %arg1: memref<16x128xf32, #tpu.memory_space<vmem>>, %arg2: memref<16x128xf32, #tpu.memory_space<vmem>>, %arg3: memref<1x8x128xf32, #tpu.memory_space<vmem>>) attributes {dimension_semantics = [#tpu.dimension_semantics<parallel>], iteration_bounds = array<i64: 1>, scalar_prefetch = 0 : i64, scratch_operands = 0 : i64, tpu.core_type = #tpu.core_type<tc>, window_params = [{transform_indices = @transform_0, window_bounds = array<i64: 16, 128>}, {transform_indices = @transform_1, window_bounds = array<i64: 16, 128>}, {transform_indices = @transform_2, window_bounds = array<i64: 1, 8, 128>}]} {
    %c0 = arith.constant 0 : index
    %c0_0 = arith.constant 0 : index
    %0 = vector.load %arg1[%c0, %c0_0] : memref<16x128xf32, #tpu.memory_space<vmem>>, vector<16x128xf32>
    %c0_1 = arith.constant 0 : index
    %c0_2 = arith.constant 0 : index
    %1 = vector.load %arg2[%c0_1, %c0_2] : memref<16x128xf32, #tpu.memory_space<vmem>>, vector<16x128xf32>
    %2 = arith.subf %0, %1 : vector<16x128xf32>
    %3 = arith.mulf %2, %2 : vector<16x128xf32>
    %cst = arith.constant 9.99999997E-7 : f32
    %4 = vector.broadcast %cst : f32 to vector<16x128xf32>
    %5 = arith.addf %3, %4 : vector<16x128xf32>
    %6 = math.rsqrt %5 : vector<16x128xf32>
    %cst_3 = arith.constant 5.000000e-01 : f32
    %7 = vector.broadcast %cst_3 : f32 to vector<16x128xf32>
    %8 = arith.mulf %7, %5 : vector<16x128xf32>
    %9 = arith.mulf %8, %6 : vector<16x128xf32>
    %10 = arith.mulf %9, %6 : vector<16x128xf32>
    %cst_4 = arith.constant 1.500000e+00 : f32
    %11 = vector.broadcast %cst_4 : f32 to vector<16x128xf32>
    %12 = arith.subf %11, %10 : vector<16x128xf32>
    %13 = arith.mulf %6, %12 : vector<16x128xf32>
    %14 = arith.mulf %5, %13 : vector<16x128xf32>
    %15 = vector.shape_cast %14 : vector<16x128xf32> to vector<2x8x128xf32>
    %cst_5 = arith.constant dense<0.000000e+00> : vector<8x128xf32>
    %16 = vector.multi_reduction <add>, %15, %cst_5 [0] : vector<2x8x128xf32> to vector<8x128xf32>
    %c0_6 = arith.constant 0 : index
    %c0_7 = arith.constant 0 : index
    %c0_8 = arith.constant 0 : index
    %17 = vector.load %arg3[%c0_6, %c0_7, %c0_8] : memref<1x8x128xf32, #tpu.memory_space<vmem>>, vector<1x8x128xf32>
    %18 = vector.shape_cast %17 : vector<1x8x128xf32> to vector<8x128xf32>
    %19 = vector.shape_cast %16 : vector<8x128xf32> to vector<1x8x128xf32>
    tpu.vector_store %arg3[%c0_6, %c0_7, %c0_8], %19 {strides = array<i32>} : memref<1x8x128xf32, #tpu.memory_space<vmem>>, vector<1x8x128xf32>,
    return
  }
  func.func @transform_0(%arg0: i32) -> (i32, i32) {
    %c0_i32 = arith.constant 0 : i32
    %c0_i32_0 = arith.constant 0 : i32
    return %arg0, %c0_i32 : i32, i32
  }
  func.func @transform_1(%arg0: i32) -> (i32, i32) {
    %c0_i32 = arith.constant 0 : i32
    %c0_i32_0 = arith.constant 0 : i32
    return %arg0, %c0_i32 : i32, i32
  }
  func.func @transform_2(%arg0: i32) -> (i32, i32, i32) {
    %c0_i32 = arith.constant 0 : i32
    %c0_i32_0 = arith.constant 0 : i32
    %c0_i32_1 = arith.constant 0 : i32
    return %arg0, %c0_i32, %c0_i32_0 : i32, i32, i32
  }
}

</mosaic_0001>

<bundles_post_ra>
// kernel: tpu_custom_call.1
= control target key start
LH: loop header
LB: loop body
LE: loop exit
PB: predicated region body
PF: predicated region fallthrough
CT: control target
= control target key end

     0   :  { %7 = vsyncpa [#allocation3], 0  ;;  %s219_s0 = inlined_call_operand.hbm [shape: f32[16,128], index: 0, kind: input, shape index: {}]   ;;  %s220_s1 = inlined_call_operand.hbm [shape: f32[16,128], index: 1, kind: input, shape index: {}]   ;;  %s221_s2 = inlined_call_operand.hbm [shape: f32[1,8,128], index: 2, kind: output, shape index: {}]  }
   0x1   :  { %8 = vsyncpa [#allocation6], 0 }
   0x2   :  { %9 = vsyncpa [#allocation4], 0  ;;  %s163_s9 = smov [#allocation2]   ;;  %s91_s13 = scalar_lea.hbm %s219_s0, 256 }
   0x3   :  { %s15_s10 = sshll.u32 %s163_s9, 4  ;;  %p92_p0 = scmp.ne.s32.totalorder %s219_s0, %s91_s13  ;;  %s16_s10 = int_to_ptr.vmem [resolvable:$true] %s15_s10 }
   0x4   :  { %p95_p1 = scmp.lt.u32.totalorder %s91_s13, %s219_s0 }
   0x6   :  { %p97_p2 = pnand %p95_p1, %p92_p0 }
   0x8   :  { %100 = shalt.err (!%p97_p2)
}
   0x9   :  { %s101_s18 = scalar_lea.vmem %s16_s10, 256  ;;  %p106_p4 = scmp.lt.s32.totalorder %s16_s10, %s16_s10 }
   0xa   :  { %p102_p3 = scmp.ne.s32.totalorder %s16_s10, %s101_s18  ;;  %p107_p5 = scmp.lt.s32.totalorder %s101_s18, %s101_s18 }
   0xc   :  { %p108_p6 = por %p107_p5, %p106_p4 }
   0xe   :  { %p109_p7 = pnand %p108_p6, %p102_p3 }
  0x10   :  { %112 = shalt.err (!%p109_p7)
}
  0x11   :  { %s164_s19 = smov 128   ;;  %s165_s20 = smov 8  }
  0x12   :  { %21 = dma.hbm_to_vmem [thread:$0]  %s219_s0, 256, %s16_s10, [#allocation3], %s164_s19, %s164_s19, %s165_s20  }
  0x13   :  { %s166_s23 = smov [#allocation5]   ;;  %s113_s27 = scalar_lea.hbm %s220_s1, 256 }
  0x14   :  { %s27_s24 = sshll.u32 %s166_s23, 4  ;;  %p114_p8 = scmp.ne.s32.totalorder %s220_s1, %s113_s27  ;;  %s28_s24 = int_to_ptr.vmem [resolvable:$true] %s27_s24 }
  0x15   :  { %p117_p9 = scmp.lt.u32.totalorder %s113_s27, %s220_s1 }
  0x17   :  { %p119_p10 = pnand %p117_p9, %p114_p8 }
  0x19   :  { %122 = shalt.err (!%p119_p10)
}
  0x1a   :  { %s123_s4 = scalar_lea.vmem %s28_s24, 256  ;;  %p128_p12 = scmp.lt.s32.totalorder %s28_s24, %s28_s24 }
  0x1b   :  { %p124_p11 = scmp.ne.s32.totalorder %s28_s24, %s123_s4  ;;  %p129_p13 = scmp.lt.s32.totalorder %s123_s4, %s123_s4 }
  0x1d   :  { %p130_p0 = por %p129_p13, %p128_p12 }
  0x1f   :  { %p131_p1 = pnand %p130_p0, %p124_p11 }
  0x21   :  { %134 = shalt.err (!%p131_p1)
}
  0x22   :  { %33 = dma.hbm_to_vmem [thread:$0]  %s220_s1, 256, %s28_s24, [#allocation6], %s164_s19, %s164_s19, %s165_s20  }
  0x23   :  { %157 = dma.done.wait [#allocation3], 256  }
  0x24   :  { %158 = vsyncadd [#allocation3], 4294967040 }
  0x25   :  { %159 = dma.done.wait [#allocation6], 256  }
  0x26   :  { %160 = vsyncadd [#allocation6], 4294967040  ;;  %v40_v0 = vld [vmem:[#allocation2] sm:$0xff]  ;;  %v41_v1 = vld [vmem:[#allocation2 + $0x8] sm:$0xff]  ;;  %s167_s1 = smov [#allocation7]  }
  0x27   :  { %v42_v2 = vld [vmem:[#allocation5] sm:$0xff]  ;;  %v43_v3 = vld [vmem:[#allocation5 + $0x8] sm:$0xff]  ;;  %s72_s6 = sshll.u32 %s167_s1, 4  ;;  %s73_s6 = int_to_ptr.vmem [resolvable:$true] %s72_s6 }
  0x28   :  { %v44_v4 = vsub.f32 %v40_v0, %v42_v2  ;;  %v45_v5 = vsub.f32 %v41_v1, %v43_v3  ;;  %s135_s7 = scalar_lea.vmem %s73_s6, 128  ;;  %p140_p3 = scmp.lt.s32.totalorder %s73_s6, %s73_s6 }
  0x29   :  { %p136_p2 = scmp.ne.s32.totalorder %s73_s6, %s135_s7  ;;  %p141_p4 = scmp.lt.s32.totalorder %s135_s7, %s135_s7 }
  0x2a   :  { %v46_v6 = vmul.f32 %v44_v4, %v44_v4  ;;  %v47_v7 = vmul.f32 %v45_v5, %v45_v5 }
  0x2b   :  { %p142_p5 = por %p141_p4, %p140_p3 }
  0x2c   :  { %v48_v8 = vadd.f32 1e-06, %v46_v6  ;;  %v49_v9 = vadd.f32 1e-06, %v47_v7 }
  0x2d   :  { %p143_p6 = pnand %p142_p5, %p136_p2 }
  0x2e   :  { %87 = vrsqrt.f32 %v48_v8  ;;  %v52_v10 = vmul.f32 0.5, %v48_v8  ;;  %v53_v11 = vmul.f32 0.5, %v49_v9 }
  0x2f   :  { %89 = vrsqrt.f32 %v49_v9 }
  0x38   :  { %v88_v12 = vpop.eup %87 }
  0x39   :  { %v90_v13 = vpop.eup %89  ;;  %v54_v14 = vmul.f32 %v88_v12, %v52_v10 }
  0x3a   :  { %v55_v15 = vmul.f32 %v90_v13, %v53_v11 }
  0x3b   :  { %v56_v16 = vmul.f32 %v88_v12, %v54_v14 }
  0x3c   :  { %v57_v17 = vmul.f32 %v90_v13, %v55_v15 }
  0x3d   :  { %v58_v18 = vsub.f32 1.5, %v56_v16 }
  0x3e   :  { %v59_v19 = vsub.f32 1.5, %v57_v17 }
  0x3f   :  { %v60_v20 = vmul.f32 %v88_v12, %v58_v18 }
  0x40   :  { %v61_v21 = vmul.f32 %v90_v13, %v59_v19 }
  0x41   :  { %v62_v22 = vmul.f32 %v60_v20, %v48_v8 }
  0x42   :  { %v63_v23 = vmul.f32 %v61_v21, %v49_v9 }
  0x44   :  { %v64_v24 = vadd.f32 %v63_v23, %v62_v22 }
  0x46   :  { %65 = vst [vmem:[#allocation7] sm:$0xff] %v64_v24 }
  0x47   :  { %146 = shalt.err (!%p143_p6)
}
  0x48   :  { %s147_s10 = scalar_lea.hbm %s221_s2, 128 }
  0x49   :  { %p148_p7 = scmp.ne.s32.totalorder %s221_s2, %s147_s10  ;;  %p151_p8 = scmp.lt.u32.totalorder %s147_s10, %s221_s2 }
  0x4b   :  { %p153_p9 = pnand %p151_p8, %p148_p7 }
  0x4d   :  { %156 = shalt.err (!%p153_p9)
}
  0x4e   :  { %75 = dma.vmem_to_hbm [thread:$0]  %s73_s6, 128, %s221_s2, [#allocation4]  }
  0x4f   :  { %161 = dma.done.wait [#allocation4], 128  }
  0x50   :  { %162 = vsyncadd [#allocation4], 4294967168 }
  0x51   :  { %79 = vsyncpa [#allocation3], 1 }
  0x52   :  { %80 = vsyncpa [#allocation6], 1 }
  0x53   :  { %81 = vsyncpa [#allocation4], 1 }

</bundles_post_ra>
